<compile_context>
chip_gen: v6e
topology: v6e:2x2x1
jax: 0.10.0
libtpu: 0.0.40
codegen_flags: <defaults>
</compile_context>

<pallas_src>
import functools
import math

import jax
import jax.numpy as jnp
from jax import lax
from jax.experimental import pallas as pl
from jax.experimental.pallas import tpu as pltpu


def _qkv_attn_kernel(q_ref, k_ref, v_ref, o_ref, *, scale, split_scale, bb):
    """One grid step: `bb` heads x one query tile.

    q_ref: (bb, C, tq)   k_ref, v_ref: (bb, C, T)   o_ref: (bb, C, tq)
    """
    for h in range(bb):  # static unroll over the heads packed into this block
        q = q_ref[h]     # (C, tq)
        k = k_ref[h]     # (C, T)
        v = v_ref[h]     # (C, T)

        if split_scale:
            # fp16: keep the split scaling of the reference to avoid overflow
            # in the score matmul.
            q = q * scale
            k = k * scale
        else:
            # f32 / bf16: fold both scales onto q -> single elementwise pass.
            q = q * (scale * scale)

        # weight[t, s] = sum_c q[c, t] * k[c, s]
        # (contraction on dim 0 of both operands -> MXU handles the orientation,
        #  no explicit transpose is materialized)
        w = lax.dot_general(q, k, (((0,), (0,)), ((), ())),
                            preferred_element_type=jnp.float32)  # (tq, T) f32

        # softmax over s in float32 (matches `.float()`), cast back afterwards
        # (matches `.type(weight.dtype)`).
        w = w - jnp.max(w, axis=-1, keepdims=True)
        w = jnp.exp(w)
        w = w * pl.reciprocal(jnp.sum(w, axis=-1, keepdims=True), approx=True)
        w = w.astype(v.dtype)

        # a[c, t] = sum_s w[t, s] * v[c, s]   (contraction on dim 1 of both)
        a = lax.dot_general(v, w, (((1,), (1,)), ((), ())),
                            preferred_element_type=jnp.float32)  # (C, tq)
        o_ref[h] = a.astype(o_ref.dtype)


def qkv_attention_legacy(qkv, n_heads):
    """Pallas implementation of QKVAttentionLegacy.forward.

    :param qkv: [N, H*3*C, T] array.
    :return:    [N, H*C, T] array.
    """
    bs, width, length = qkv.shape
    assert width % (3 * n_heads) == 0
    ch = width // (3 * n_heads)
    scale = 1.0 / math.sqrt(math.sqrt(ch))

    B = bs * n_heads
    T = length
    qkv_r = qkv.reshape(B, 3 * ch, T)

    # ---- query-axis tiling: bound the live (tq, T) f32 score tile ----------
    # Full (T, T) scores would blow scoped VMEM (and v7x's 64 MiB) at long T.
    # tq = 256 keeps the score tile small enough for v7x even at T = 4096.
    if T >= 1024 and T % 128 == 0:
        tq = 256 if T % 256 == 0 else 128
    else:
        tq = T
    n_tq = T // tq

    # ---- head batching: amortize per-grid-step overhead at small/medium T ---
    # (skipped when q-tiling is active; capped so f32 score temps stay modest)
    if n_tq == 1:
        max_bb = max(1, (16 * 1024 * 1024) // (3 * T * T * 4))
        bb = 1
        for cand in (8, 4, 2):
            if B % cand == 0 and cand <= max_bb:
                bb = cand
                break
    else:
        bb = 1
    n_b = B // bb

    # ---- BlockSpecs ---------------------------------------------------------
    # Slice q / k / v straight out of the packed (B, 3*C, T) tensor using three
    # index_maps over the channel-block axis -> no extra HBM copies of q/k/v.
    if ch % 8 == 0:
        q_spec = pl.BlockSpec((bb, ch, tq), lambda i, j: (i, 0, j))
        k_spec = pl.BlockSpec((bb, ch, T), lambda i, j: (i, 1, 0))
        v_spec = pl.BlockSpec((bb, ch, T), lambda i, j: (i, 2, 0))
        inputs = (qkv_r, qkv_r, qkv_r)
    else:
        # Sublane-unaligned head dim: fall back to wrapper-side slicing
        # (one extra HBM pass; not hit by typical guided_diffusion configs).
        q = qkv_r[:, 0 * ch:1 * ch, :]
        k = qkv_r[:, 1 * ch:2 * ch, :]
        v = qkv_r[:, 2 * ch:3 * ch, :]
        q_spec = pl.BlockSpec((bb, ch, tq), lambda i, j: (i, 0, j))
        k_spec = pl.BlockSpec((bb, ch, T), lambda i, j: (i, 0, 0))
        v_spec = pl.BlockSpec((bb, ch, T), lambda i, j: (i, 0, 0))
        inputs = (q, k, v)

    out_spec = pl.BlockSpec((bb, ch, tq), lambda i, j: (i, 0, j))

    # ---- scoped-VMEM budget derived from the chosen tiles (~30% headroom) ---
    itemsize = jnp.dtype(qkv.dtype).itemsize
    block_bytes = 2 * itemsize * bb * ch * (tq + 2 * T + tq)  # dbl-buffered q,k,v,out
    score_bytes = 3 * bb * tq * T * 4                          # f32 score/exp temps
    vmem_limit = int(1.3 * (block_bytes + score_bytes))
    vmem_limit = min(max(vmem_limit, 32 * 1024 * 1024), 64 * 1024 * 1024)

    kernel = functools.partial(
        _qkv_attn_kernel,
        scale=scale,
        split_scale=(qkv.dtype == jnp.float16),
        bb=bb,
    )

    out = pl.pallas_call(
        kernel,
        out_shape=jax.ShapeDtypeStruct((B, ch, T), qkv.dtype),
        grid_spec=pltpu.PrefetchScalarGridSpec(
            num_scalar_prefetch=0,
            grid=(n_b, n_tq),
            in_specs=[q_spec, k_spec, v_spec],
            out_specs=out_spec,
        ),
        compiler_params=pltpu.CompilerParams(
            dimension_semantics=("parallel", "parallel"),
            vmem_limit_bytes=vmem_limit,
        ),
    )(*inputs)

    return out.reshape(bs, n_heads * ch, length)


def _reference(qkv, n_heads):
    bs, width, length = qkv.shape
    ch = width // (3 * n_heads)
    x = qkv.reshape(bs * n_heads, 3 * ch, length)
    q, k, v = x[:, :ch], x[:, ch:2 * ch], x[:, 2 * ch:]
    scale = 1.0 / math.sqrt(math.sqrt(ch))
    w = jnp.einsum("bct,bcs->bts", q * scale, k * scale)
    w = jax.nn.softmax(w.astype(jnp.float32), axis=-1).astype(qkv.dtype)
    a = jnp.einsum("bts,bcs->bct", w, v)
    return a.reshape(bs, -1, length)


if __name__ == "__main__":
    # Small shapes consistent with the module's forward:
    # N=2, n_heads=4, head_dim C=8, T=16  ->  width = 4*3*8 = 96
    n_heads = 4
    N, C, T = 2, 8, 16
    width = n_heads * 3 * C

    key = jax.random.PRNGKey(0)
    k0, k1 = jax.random.split(key)
    qkv = jax.random.normal(k0, (N, width, T), dtype=jnp.float32)

    out = jax.block_until_ready(qkv_attention_legacy(qkv, n_heads))
    ref = _reference(qkv, n_heads)
    assert out.shape == (N, n_heads * C, T)
    # Tolerance covers the approximate EUP reciprocal used for the softmax
    # normalization; structural errors would be orders of magnitude larger.
    assert jnp.allclose(out, ref, atol=2e-3, rtol=2e-3), float(
        jnp.max(jnp.abs(out - ref)))

    # Also exercise the query-tiled path (tq < T) on a longer sequence.
    n_heads2, N2, C2, T2 = 2, 1, 8, 1024
    qkv2 = jax.random.normal(k1, (N2, n_heads2 * 3 * C2, T2), dtype=jnp.float32)
    out2 = jax.block_until_ready(qkv_attention_legacy(qkv2, n_heads2))
    ref2 = _reference(qkv2, n_heads2)
    assert out2.shape == (N2, n_heads2 * C2, T2)
    assert jnp.allclose(out2, ref2, atol=2e-3, rtol=2e-3), float(
        jnp.max(jnp.abs(out2 - ref2)))

    print("KERNEL_OK")
</pallas_src>

<mosaic_0001>
module attributes {stable_mosaic.version = 11 : i64} {
  func.func @_qkv_attn_kernel(%arg0: i32, %arg1: i32, %arg2: memref<8x8x16xf32, #tpu.memory_space<vmem>>, %arg3: memref<8x8x16xf32, #tpu.memory_space<vmem>>, %arg4: memref<8x8x16xf32, #tpu.memory_space<vmem>>, %arg5: memref<8x8x16xf32, #tpu.memory_space<vmem>>) attributes {dimension_semantics = [#tpu.dimension_semantics<parallel>, #tpu.dimension_semantics<parallel>], iteration_bounds = array<i64: 1, 1>, scalar_prefetch = 0 : i64, scratch_operands = 0 : i64, tpu.core_type = #tpu.core_type<tc>, window_params = [{transform_indices = @transform_0, window_bounds = array<i64: 8, 8, 16>}, {transform_indices = @transform_1, window_bounds = array<i64: 8, 8, 16>}, {transform_indices = @transform_2, window_bounds = array<i64: 8, 8, 16>}, {transform_indices = @transform_3, window_bounds = array<i64: 8, 8, 16>}]} {
    %c0 = arith.constant 0 : index
    %c0_0 = arith.constant 0 : index
    %c0_1 = arith.constant 0 : index
    %0 = vector.load %arg2[%c0, %c0_0, %c0_1] : memref<8x8x16xf32, #tpu.memory_space<vmem>>, vector<1x8x16xf32>
    %1 = vector.shape_cast %0 : vector<1x8x16xf32> to vector<8x16xf32>
    %c0_2 = arith.constant 0 : index
    %c0_3 = arith.constant 0 : index
    %c0_4 = arith.constant 0 : index
    %2 = vector.load %arg3[%c0_2, %c0_3, %c0_4] : memref<8x8x16xf32, #tpu.memory_space<vmem>>, vector<1x8x16xf32>
    %3 = vector.shape_cast %2 : vector<1x8x16xf32> to vector<8x16xf32>
    %c0_5 = arith.constant 0 : index
    %c0_6 = arith.constant 0 : index
    %c0_7 = arith.constant 0 : index
    %4 = vector.load %arg4[%c0_5, %c0_6, %c0_7] : memref<8x8x16xf32, #tpu.memory_space<vmem>>, vector<1x8x16xf32>
    %5 = vector.shape_cast %4 : vector<1x8x16xf32> to vector<8x16xf32>
    %cst = arith.constant 0.353553385 : f32
    %6 = vector.broadcast %cst : f32 to vector<8x16xf32>
    %7 = arith.mulf %1, %6 : vector<8x16xf32>
    %cst_8 = arith.constant dense<0.000000e+00> : vector<16x16xf32>
    %8 = tpu.matmul %7, %3, %cst_8 {dimension_numbers = #tpu.dot_dimension_numbers<[0], [0], [1], [1], [0, 1, 1, 1], [], []>} : vector<8x16xf32>, vector<8x16xf32>, vector<16x16xf32> -> vector<16x16xf32>
    %cst_9 = arith.constant dense<0xFF800000> : vector<16xf32>
    %9 = vector.multi_reduction <maximumf>, %8, %cst_9 [1] : vector<16x16xf32> to vector<16xf32>
    %10 = vector.shape_cast %9 : vector<16xf32> to vector<16x1xf32>
    %11 = vector.broadcast %10 : vector<16x1xf32> to vector<16x16xf32>
    %12 = arith.subf %8, %11 : vector<16x16xf32>
    %13 = math.exp %12 : vector<16x16xf32>
    %cst_10 = arith.constant dense<0.000000e+00> : vector<16xf32>
    %14 = vector.multi_reduction <add>, %13, %cst_10 [1] : vector<16x16xf32> to vector<16xf32>
    %15 = vector.shape_cast %14 : vector<16xf32> to vector<16x1xf32>
    %16 = tpu.reciprocal %15 {approx = true} : vector<16x1xf32> -> vector<16x1xf32>
    %17 = vector.broadcast %16 : vector<16x1xf32> to vector<16x16xf32>
    %18 = arith.mulf %13, %17 : vector<16x16xf32>
    %cst_11 = arith.constant dense<0.000000e+00> : vector<8x16xf32>
    %19 = tpu.matmul %5, %18, %cst_11 {dimension_numbers = #tpu.dot_dimension_numbers<[1], [1], [0], [0], [0, 0, 1, 0], [], []>} : vector<8x16xf32>, vector<16x16xf32>, vector<8x16xf32> -> vector<8x16xf32>
    %c0_12 = arith.constant 0 : index
    %c0_13 = arith.constant 0 : index
    %c0_14 = arith.constant 0 : index
    %20 = vector.load %arg5[%c0_12, %c0_13, %c0_14] : memref<8x8x16xf32, #tpu.memory_space<vmem>>, vector<1x8x16xf32>
    %21 = vector.shape_cast %20 : vector<1x8x16xf32> to vector<8x16xf32>
    %22 = vector.shape_cast %19 : vector<8x16xf32> to vector<1x8x16xf32>
    tpu.vector_store %arg5[%c0_12, %c0_13, %c0_14], %22 {strides = array<i32>} : memref<8x8x16xf32, #tpu.memory_space<vmem>>, vector<1x8x16xf32>,
    %c1 = arith.constant 1 : index
    %c0_15 = arith.constant 0 : index
    %c0_16 = arith.constant 0 : index
    %23 = vector.load %arg2[%c1, %c0_15, %c0_16] : memref<8x8x16xf32, #tpu.memory_space<vmem>>, vector<1x8x16xf32>
    %24 = vector.shape_cast %23 : vector<1x8x16xf32> to vector<8x16xf32>
    %c1_17 = arith.constant 1 : index
    %c0_18 = arith.constant 0 : index
    %c0_19 = arith.constant 0 : index
    %25 = vector.load %arg3[%c1_17, %c0_18, %c0_19] : memref<8x8x16xf32, #tpu.memory_space<vmem>>, vector<1x8x16xf32>
    %26 = vector.shape_cast %25 : vector<1x8x16xf32> to vector<8x16xf32>
    %c1_20 = arith.constant 1 : index
    %c0_21 = arith.constant 0 : index
    %c0_22 = arith.constant 0 : index
    %27 = vector.load %arg4[%c1_20, %c0_21, %c0_22] : memref<8x8x16xf32, #tpu.memory_space<vmem>>, vector<1x8x16xf32>
    %28 = vector.shape_cast %27 : vector<1x8x16xf32> to vector<8x16xf32>
    %cst_23 = arith.constant 0.353553385 : f32
    %29 = vector.broadcast %cst_23 : f32 to vector<8x16xf32>
    %30 = arith.mulf %24, %29 : vector<8x16xf32>
    %cst_24 = arith.constant dense<0.000000e+00> : vector<16x16xf32>
    %31 = tpu.matmul %30, %26, %cst_24 {dimension_numbers = #tpu.dot_dimension_numbers<[0], [0], [1], [1], [0, 1, 1, 1], [], []>} : vector<8x16xf32>, vector<8x16xf32>, vector<16x16xf32> -> vector<16x16xf32>
    %cst_25 = arith.constant dense<0xFF800000> : vector<16xf32>
    %32 = vector.multi_reduction <maximumf>, %31, %cst_25 [1] : vector<16x16xf32> to vector<16xf32>
    %33 = vector.shape_cast %32 : vector<16xf32> to vector<16x1xf32>
    %34 = vector.broadcast %33 : vector<16x1xf32> to vector<16x16xf32>
    %35 = arith.subf %31, %34 : vector<16x16xf32>
    %36 = math.exp %35 : vector<16x16xf32>
    %cst_26 = arith.constant dense<0.000000e+00> : vector<16xf32>
    %37 = vector.multi_reduction <add>, %36, %cst_26 [1] : vector<16x16xf32> to vector<16xf32>
    %38 = vector.shape_cast %37 : vector<16xf32> to vector<16x1xf32>
    %39 = tpu.reciprocal %38 {approx = true} : vector<16x1xf32> -> vector<16x1xf32>
    %40 = vector.broadcast %39 : vector<16x1xf32> to vector<16x16xf32>
    %41 = arith.mulf %36, %40 : vector<16x16xf32>
    %cst_27 = arith.constant dense<0.000000e+00> : vector<8x16xf32>
    %42 = tpu.matmul %28, %41, %cst_27 {dimension_numbers = #tpu.dot_dimension_numbers<[1], [1], [0], [0], [0, 0, 1, 0], [], []>} : vector<8x16xf32>, vector<16x16xf32>, vector<8x16xf32> -> vector<8x16xf32>
    %c1_28 = arith.constant 1 : index
    %c0_29 = arith.constant 0 : index
    %c0_30 = arith.constant 0 : index
    %43 = vector.load %arg5[%c1_28, %c0_29, %c0_30] : memref<8x8x16xf32, #tpu.memory_space<vmem>>, vector<1x8x16xf32>
    %44 = vector.shape_cast %43 : vector<1x8x16xf32> to vector<8x16xf32>
    %45 = vector.shape_cast %42 : vector<8x16xf32> to vector<1x8x16xf32>
    tpu.vector_store %arg5[%c1_28, %c0_29, %c0_30], %45 {strides = array<i32>} : memref<8x8x16xf32, #tpu.memory_space<vmem>>, vector<1x8x16xf32>,
    %c2 = arith.constant 2 : index
    %c0_31 = arith.constant 0 : index
    %c0_32 = arith.constant 0 : index
    %46 = vector.load %arg2[%c2, %c0_31, %c0_32] : memref<8x8x16xf32, #tpu.memory_space<vmem>>, vector<1x8x16xf32>
    %47 = vector.shape_cast %46 : vector<1x8x16xf32> to vector<8x16xf32>
    %c2_33 = arith.constant 2 : index
    %c0_34 = arith.constant 0 : index
    %c0_35 = arith.constant 0 : index
    %48 = vector.load %arg3[%c2_33, %c0_34, %c0_35] : memref<8x8x16xf32, #tpu.memory_space<vmem>>, vector<1x8x16xf32>
    %49 = vector.shape_cast %48 : vector<1x8x16xf32> to vector<8x16xf32>
    %c2_36 = arith.constant 2 : index
    %c0_37 = arith.constant 0 : index
    %c0_38 = arith.constant 0 : index
    %50 = vector.load %arg4[%c2_36, %c0_37, %c0_38] : memref<8x8x16xf32, #tpu.memory_space<vmem>>, vector<1x8x16xf32>
    %51 = vector.shape_cast %50 : vector<1x8x16xf32> to vector<8x16xf32>
    %cst_39 = arith.constant 0.353553385 : f32
    %52 = vector.broadcast %cst_39 : f32 to vector<8x16xf32>
    %53 = arith.mulf %47, %52 : vector<8x16xf32>
    %cst_40 = arith.constant dense<0.000000e+00> : vector<16x16xf32>
    %54 = tpu.matmul %53, %49, %cst_40 {dimension_numbers = #tpu.dot_dimension_numbers<[0], [0], [1], [1], [0, 1, 1, 1], [], []>} : vector<8x16xf32>, vector<8x16xf32>, vector<16x16xf32> -> vector<16x16xf32>
    %cst_41 = arith.constant dense<0xFF800000> : vector<16xf32>
    %55 = vector.multi_reduction <maximumf>, %54, %cst_41 [1] : vector<16x16xf32> to vector<16xf32>
    %56 = vector.shape_cast %55 : vector<16xf32> to vector<16x1xf32>
    %57 = vector.broadcast %56 : vector<16x1xf32> to vector<16x16xf32>
    %58 = arith.subf %54, %57 : vector<16x16xf32>
    %59 = math.exp %58 : vector<16x16xf32>
    %cst_42 = arith.constant dense<0.000000e+00> : vector<16xf32>
    %60 = vector.multi_reduction <add>, %59, %cst_42 [1] : vector<16x16xf32> to vector<16xf32>
    %61 = vector.shape_cast %60 : vector<16xf32> to vector<16x1xf32>
    %62 = tpu.reciprocal %61 {approx = true} : vector<16x1xf32> -> vector<16x1xf32>
    %63 = vector.broadcast %62 : vector<16x1xf32> to vector<16x16xf32>
    %64 = arith.mulf %59, %63 : vector<16x16xf32>
    %cst_43 = arith.constant dense<0.000000e+00> : vector<8x16xf32>
    %65 = tpu.matmul %51, %64, %cst_43 {dimension_numbers = #tpu.dot_dimension_numbers<[1], [1], [0], [0], [0, 0, 1, 0], [], []>} : vector<8x16xf32>, vector<16x16xf32>, vector<8x16xf32> -> vector<8x16xf32>
    %c2_44 = arith.constant 2 : index
    %c0_45 = arith.constant 0 : index
    %c0_46 = arith.constant 0 : index
    %66 = vector.load %arg5[%c2_44, %c0_45, %c0_46] : memref<8x8x16xf32, #tpu.memory_space<vmem>>, vector<1x8x16xf32>
    %67 = vector.shape_cast %66 : vector<1x8x16xf32> to vector<8x16xf32>
    %68 = vector.shape_cast %65 : vector<8x16xf32> to vector<1x8x16xf32>
    tpu.vector_store %arg5[%c2_44, %c0_45, %c0_46], %68 {strides = array<i32>} : memref<8x8x16xf32, #tpu.memory_space<vmem>>, vector<1x8x16xf32>,
    %c3 = arith.constant 3 : index
    %c0_47 = arith.constant 0 : index
    %c0_48 = arith.constant 0 : index
    %69 = vector.load %arg2[%c3, %c0_47, %c0_48] : memref<8x8x16xf32, #tpu.memory_space<vmem>>, vector<1x8x16xf32>
    %70 = vector.shape_cast %69 : vector<1x8x16xf32> to vector<8x16xf32>
    %c3_49 = arith.constant 3 : index
    %c0_50 = arith.constant 0 : index
    %c0_51 = arith.constant 0 : index
    %71 = vector.load %arg3[%c3_49, %c0_50, %c0_51] : memref<8x8x16xf32, #tpu.memory_space<vmem>>, vector<1x8x16xf32>
    %72 = vector.shape_cast %71 : vector<1x8x16xf32> to vector<8x16xf32>
    %c3_52 = arith.constant 3 : index
    %c0_53 = arith.constant 0 : index
    %c0_54 = arith.constant 0 : index
    %73 = vector.load %arg4[%c3_52, %c0_53, %c0_54] : memref<8x8x16xf32, #tpu.memory_space<vmem>>, vector<1x8x16xf32>
    %74 = vector.shape_cast %73 : vector<1x8x16xf32> to vector<8x16xf32>
    %cst_55 = arith.constant 0.353553385 : f32
    %75 = vector.broadcast %cst_55 : f32 to vector<8x16xf32>
    %76 = arith.mulf %70, %75 : vector<8x16xf32>
    %cst_56 = arith.constant dense<0.000000e+00> : vector<16x16xf32>
    %77 = tpu.matmul %76, %72, %cst_56 {dimension_numbers = #tpu.dot_dimension_numbers<[0], [0], [1], [1], [0, 1, 1, 1], [], []>} : vector<8x16xf32>, vector<8x16xf32>, vector<16x16xf32> -> vector<16x16xf32>
    %cst_57 = arith.constant dense<0xFF800000> : vector<16xf32>
    %78 = vector.multi_reduction <maximumf>, %77, %cst_57 [1] : vector<16x16xf32> to vector<16xf32>
    %79 = vector.shape_cast %78 : vector<16xf32> to vector<16x1xf32>
    %80 = vector.broadcast %79 : vector<16x1xf32> to vector<16x16xf32>
    %81 = arith.subf %77, %80 : vector<16x16xf32>
    %82 = math.exp %81 : vector<16x16xf32>
    %cst_58 = arith.constant dense<0.000000e+00> : vector<16xf32>
    %83 = vector.multi_reduction <add>, %82, %cst_58 [1] : vector<16x16xf32> to vector<16xf32>
    %84 = vector.shape_cast %83 : vector<16xf32> to vector<16x1xf32>
    %85 = tpu.reciprocal %84 {approx = true} : vector<16x1xf32> -> vector<16x1xf32>
    %86 = vector.broadcast %85 : vector<16x1xf32> to vector<16x16xf32>
    %87 = arith.mulf %82, %86 : vector<16x16xf32>
    %cst_59 = arith.constant dense<0.000000e+00> : vector<8x16xf32>
    %88 = tpu.matmul %74, %87, %cst_59 {dimension_numbers = #tpu.dot_dimension_numbers<[1], [1], [0], [0], [0, 0, 1, 0], [], []>} : vector<8x16xf32>, vector<16x16xf32>, vector<8x16xf32> -> vector<8x16xf32>
    %c3_60 = arith.constant 3 : index
    %c0_61 = arith.constant 0 : index
    %c0_62 = arith.constant 0 : index
    %89 = vector.load %arg5[%c3_60, %c0_61, %c0_62] : memref<8x8x16xf32, #tpu.memory_space<vmem>>, vector<1x8x16xf32>
    %90 = vector.shape_cast %89 : vector<1x8x16xf32> to vector<8x16xf32>
    %91 = vector.shape_cast %88 : vector<8x16xf32> to vector<1x8x16xf32>
    tpu.vector_store %arg5[%c3_60, %c0_61, %c0_62], %91 {strides = array<i32>} : memref<8x8x16xf32, #tpu.memory_space<vmem>>, vector<1x8x16xf32>,
    %c4 = arith.constant 4 : index
    %c0_63 = arith.constant 0 : index
    %c0_64 = arith.constant 0 : index
    %92 = vector.load %arg2[%c4, %c0_63, %c0_64] : memref<8x8x16xf32, #tpu.memory_space<vmem>>, vector<1x8x16xf32>
    %93 = vector.shape_cast %92 : vector<1x8x16xf32> to vector<8x16xf32>
    %c4_65 = arith.constant 4 : index
    %c0_66 = arith.constant 0 : index
    %c0_67 = arith.constant 0 : index
    %94 = vector.load %arg3[%c4_65, %c0_66, %c0_67] : memref<8x8x16xf32, #tpu.memory_space<vmem>>, vector<1x8x16xf32>
    %95 = vector.shape_cast %94 : vector<1x8x16xf32> to vector<8x16xf32>
    %c4_68 = arith.constant 4 : index
    %c0_69 = arith.constant 0 : index
    %c0_70 = arith.constant 0 : index
    %96 = vector.load %arg4[%c4_68, %c0_69, %c0_70] : memref<8x8x16xf32, #tpu.memory_space<vmem>>, vector<1x8x16xf32>
    %97 = vector.shape_cast %96 : vector<1x8x16xf32> to vector<8x16xf32>
    %cst_71 = arith.constant 0.353553385 : f32
    %98 = vector.broadcast %cst_71 : f32 to vector<8x16xf32>
    %99 = arith.mulf %93, %98 : vector<8x16xf32>
    %cst_72 = arith.constant dense<0.000000e+00> : vector<16x16xf32>
    %100 = tpu.matmul %99, %95, %cst_72 {dimension_numbers = #tpu.dot_dimension_numbers<[0], [0], [1], [1], [0, 1, 1, 1], [], []>} : vector<8x16xf32>, vector<8x16xf32>, vector<16x16xf32> -> vector<16x16xf32>
    %cst_73 = arith.constant dense<0xFF800000> : vector<16xf32>
    %101 = vector.multi_reduction <maximumf>, %100, %cst_73 [1] : vector<16x16xf32> to vector<16xf32>
    %102 = vector.shape_cast %101 : vector<16xf32> to vector<16x1xf32>
    %103 = vector.broadcast %102 : vector<16x1xf32> to vector<16x16xf32>
    %104 = arith.subf %100, %103 : vector<16x16xf32>
    %105 = math.exp %104 : vector<16x16xf32>
    %cst_74 = arith.constant dense<0.000000e+00> : vector<16xf32>
    %106 = vector.multi_reduction <add>, %105, %cst_74 [1] : vector<16x16xf32> to vector<16xf32>
    %107 = vector.shape_cast %106 : vector<16xf32> to vector<16x1xf32>
    %108 = tpu.reciprocal %107 {approx = true} : vector<16x1xf32> -> vector<16x1xf32>
    %109 = vector.broadcast %108 : vector<16x1xf32> to vector<16x16xf32>
    %110 = arith.mulf %105, %109 : vector<16x16xf32>
    %cst_75 = arith.constant dense<0.000000e+00> : vector<8x16xf32>
    %111 = tpu.matmul %97, %110, %cst_75 {dimension_numbers = #tpu.dot_dimension_numbers<[1], [1], [0], [0], [0, 0, 1, 0], [], []>} : vector<8x16xf32>, vector<16x16xf32>, vector<8x16xf32> -> vector<8x16xf32>
    %c4_76 = arith.constant 4 : index
    %c0_77 = arith.constant 0 : index
    %c0_78 = arith.constant 0 : index
    %112 = vector.load %arg5[%c4_76, %c0_77, %c0_78] : memref<8x8x16xf32, #tpu.memory_space<vmem>>, vector<1x8x16xf32>
    %113 = vector.shape_cast %112 : vector<1x8x16xf32> to vector<8x16xf32>
    %114 = vector.shape_cast %111 : vector<8x16xf32> to vector<1x8x16xf32>
    tpu.vector_store %arg5[%c4_76, %c0_77, %c0_78], %114 {strides = array<i32>} : memref<8x8x16xf32, #tpu.memory_space<vmem>>, vector<1x8x16xf32>,
    %c5 = arith.constant 5 : index
    %c0_79 = arith.constant 0 : index
    %c0_80 = arith.constant 0 : index
    %115 = vector.load %arg2[%c5, %c0_79, %c0_80] : memref<8x8x16xf32, #tpu.memory_space<vmem>>, vector<1x8x16xf32>
    %116 = vector.shape_cast %115 : vector<1x8x16xf32> to vector<8x16xf32>
    %c5_81 = arith.constant 5 : index
    %c0_82 = arith.constant 0 : index
    %c0_83 = arith.constant 0 : index
    %117 = vector.load %arg3[%c5_81, %c0_82, %c0_83] : memref<8x8x16xf32, #tpu.memory_space<vmem>>, vector<1x8x16xf32>
    %118 = vector.shape_cast %117 : vector<1x8x16xf32> to vector<8x16xf32>
    %c5_84 = arith.constant 5 : index
    %c0_85 = arith.constant 0 : index
    %c0_86 = arith.constant 0 : index
    %119 = vector.load %arg4[%c5_84, %c0_85, %c0_86] : memref<8x8x16xf32, #tpu.memory_space<vmem>>, vector<1x8x16xf32>
    %120 = vector.shape_cast %119 : vector<1x8x16xf32> to vector<8x16xf32>
    %cst_87 = arith.constant 0.353553385 : f32
    %121 = vector.broadcast %cst_87 : f32 to vector<8x16xf32>
    %122 = arith.mulf %116, %121 : vector<8x16xf32>
    %cst_88 = arith.constant dense<0.000000e+00> : vector<16x16xf32>
    %123 = tpu.matmul %122, %118, %cst_88 {dimension_numbers = #tpu.dot_dimension_numbers<[0], [0], [1], [1], [0, 1, 1, 1], [], []>} : vector<8x16xf32>, vector<8x16xf32>, vector<16x16xf32> -> vector<16x16xf32>
    %cst_89 = arith.constant dense<0xFF800000> : vector<16xf32>
    %124 = vector.multi_reduction <maximumf>, %123, %cst_89 [1] : vector<16x16xf32> to vector<16xf32>
    %125 = vector.shape_cast %124 : vector<16xf32> to vector<16x1xf32>
    %126 = vector.broadcast %125 : vector<16x1xf32> to vector<16x16xf32>
    %127 = arith.subf %123, %126 : vector<16x16xf32>
    %128 = math.exp %127 : vector<16x16xf32>
    %cst_90 = arith.constant dense<0.000000e+00> : vector<16xf32>
    %129 = vector.multi_reduction <add>, %128, %cst_90 [1] : vector<16x16xf32> to vector<16xf32>
    %130 = vector.shape_cast %129 : vector<16xf32> to vector<16x1xf32>
    %131 = tpu.reciprocal %130 {approx = true} : vector<16x1xf32> -> vector<16x1xf32>
    %132 = vector.broadcast %131 : vector<16x1xf32> to vector<16x16xf32>
    %133 = arith.mulf %128, %132 : vector<16x16xf32>
    %cst_91 = arith.constant dense<0.000000e+00> : vector<8x16xf32>
    %134 = tpu.matmul %120, %133, %cst_91 {dimension_numbers = #tpu.dot_dimension_numbers<[1], [1], [0], [0], [0, 0, 1, 0], [], []>} : vector<8x16xf32>, vector<16x16xf32>, vector<8x16xf32> -> vector<8x16xf32>
    %c5_92 = arith.constant 5 : index
    %c0_93 = arith.constant 0 : index
    %c0_94 = arith.constant 0 : index
    %135 = vector.load %arg5[%c5_92, %c0_93, %c0_94] : memref<8x8x16xf32, #tpu.memory_space<vmem>>, vector<1x8x16xf32>
    %136 = vector.shape_cast %135 : vector<1x8x16xf32> to vector<8x16xf32>
    %137 = vector.shape_cast %134 : vector<8x16xf32> to vector<1x8x16xf32>
    tpu.vector_store %arg5[%c5_92, %c0_93, %c0_94], %137 {strides = array<i32>} : memref<8x8x16xf32, #tpu.memory_space<vmem>>, vector<1x8x16xf32>,
    %c6 = arith.constant 6 : index
    %c0_95 = arith.constant 0 : index
    %c0_96 = arith.constant 0 : index
    %138 = vector.load %arg2[%c6, %c0_95, %c0_96] : memref<8x8x16xf32, #tpu.memory_space<vmem>>, vector<1x8x16xf32>
    %139 = vector.shape_cast %138 : vector<1x8x16xf32> to vector<8x16xf32>
    %c6_97 = arith.constant 6 : index
    %c0_98 = arith.constant 0 : index
    %c0_99 = arith.constant 0 : index
    %140 = vector.load %arg3[%c6_97, %c0_98, %c0_99] : memref<8x8x16xf32, #tpu.memory_space<vmem>>, vector<1x8x16xf32>
    %141 = vector.shape_cast %140 : vector<1x8x16xf32> to vector<8x16xf32>
    %c6_100 = arith.constant 6 : index
    %c0_101 = arith.constant 0 : index
    %c0_102 = arith.constant 0 : index
    %142 = vector.load %arg4[%c6_100, %c0_101, %c0_102] : memref<8x8x16xf32, #tpu.memory_space<vmem>>, vector<1x8x16xf32>
    %143 = vector.shape_cast %142 : vector<1x8x16xf32> to vector<8x16xf32>
    %cst_103 = arith.constant 0.353553385 : f32
    %144 = vector.broadcast %cst_103 : f32 to vector<8x16xf32>
    %145 = arith.mulf %139, %144 : vector<8x16xf32>
    %cst_104 = arith.constant dense<0.000000e+00> : vector<16x16xf32>
    %146 = tpu.matmul %145, %141, %cst_104 {dimension_numbers = #tpu.dot_dimension_numbers<[0], [0], [1], [1], [0, 1, 1, 1], [], []>} : vector<8x16xf32>, vector<8x16xf32>, vector<16x16xf32> -> vector<16x16xf32>
    %cst_105 = arith.constant dense<0xFF800000> : vector<16xf32>
    %147 = vector.multi_reduction <maximumf>, %146, %cst_105 [1] : vector<16x16xf32> to vector<16xf32>
    %148 = vector.shape_cast %147 : vector<16xf32> to vector<16x1xf32>
    %149 = vector.broadcast %148 : vector<16x1xf32> to vector<16x16xf32>
    %150 = arith.subf %146, %149 : vector<16x16xf32>
    %151 = math.exp %150 : vector<16x16xf32>
    %cst_106 = arith.constant dense<0.000000e+00> : vector<16xf32>
    %152 = vector.multi_reduction <add>, %151, %cst_106 [1] : vector<16x16xf32> to vector<16xf32>
    %153 = vector.shape_cast %152 : vector<16xf32> to vector<16x1xf32>
    %154 = tpu.reciprocal %153 {approx = true} : vector<16x1xf32> -> vector<16x1xf32>
    %155 = vector.broadcast %154 : vector<16x1xf32> to vector<16x16xf32>
    %156 = arith.mulf %151, %155 : vector<16x16xf32>
    %cst_107 = arith.constant dense<0.000000e+00> : vector<8x16xf32>
    %157 = tpu.matmul %143, %156, %cst_107 {dimension_numbers = #tpu.dot_dimension_numbers<[1], [1], [0], [0], [0, 0, 1, 0], [], []>} : vector<8x16xf32>, vector<16x16xf32>, vector<8x16xf32> -> vector<8x16xf32>
    %c6_108 = arith.constant 6 : index
    %c0_109 = arith.constant 0 : index
    %c0_110 = arith.constant 0 : index
    %158 = vector.load %arg5[%c6_108, %c0_109, %c0_110] : memref<8x8x16xf32, #tpu.memory_space<vmem>>, vector<1x8x16xf32>
    %159 = vector.shape_cast %158 : vector<1x8x16xf32> to vector<8x16xf32>
    %160 = vector.shape_cast %157 : vector<8x16xf32> to vector<1x8x16xf32>
    tpu.vector_store %arg5[%c6_108, %c0_109, %c0_110], %160 {strides = array<i32>} : memref<8x8x16xf32, #tpu.memory_space<vmem>>, vector<1x8x16xf32>,
    %c7 = arith.constant 7 : index
    %c0_111 = arith.constant 0 : index
    %c0_112 = arith.constant 0 : index
    %161 = vector.load %arg2[%c7, %c0_111, %c0_112] : memref<8x8x16xf32, #tpu.memory_space<vmem>>, vector<1x8x16xf32>
    %162 = vector.shape_cast %161 : vector<1x8x16xf32> to vector<8x16xf32>
    %c7_113 = arith.constant 7 : index
    %c0_114 = arith.constant 0 : index
    %c0_115 = arith.constant 0 : index
    %163 = vector.load %arg3[%c7_113, %c0_114, %c0_115] : memref<8x8x16xf32, #tpu.memory_space<vmem>>, vector<1x8x16xf32>
    %164 = vector.shape_cast %163 : vector<1x8x16xf32> to vector<8x16xf32>
    %c7_116 = arith.constant 7 : index
    %c0_117 = arith.constant 0 : index
    %c0_118 = arith.constant 0 : index
    %165 = vector.load %arg4[%c7_116, %c0_117, %c0_118] : memref<8x8x16xf32, #tpu.memory_space<vmem>>, vector<1x8x16xf32>
    %166 = vector.shape_cast %165 : vector<1x8x16xf32> to vector<8x16xf32>
    %cst_119 = arith.constant 0.353553385 : f32
    %167 = vector.broadcast %cst_119 : f32 to vector<8x16xf32>
    %168 = arith.mulf %162, %167 : vector<8x16xf32>
    %cst_120 = arith.constant dense<0.000000e+00> : vector<16x16xf32>
    %169 = tpu.matmul %168, %164, %cst_120 {dimension_numbers = #tpu.dot_dimension_numbers<[0], [0], [1], [1], [0, 1, 1, 1], [], []>} : vector<8x16xf32>, vector<8x16xf32>, vector<16x16xf32> -> vector<16x16xf32>
    %cst_121 = arith.constant dense<0xFF800000> : vector<16xf32>
    %170 = vector.multi_reduction <maximumf>, %169, %cst_121 [1] : vector<16x16xf32> to vector<16xf32>
    %171 = vector.shape_cast %170 : vector<16xf32> to vector<16x1xf32>
    %172 = vector.broadcast %171 : vector<16x1xf32> to vector<16x16xf32>
    %173 = arith.subf %169, %172 : vector<16x16xf32>
    %174 = math.exp %173 : vector<16x16xf32>
    %cst_122 = arith.constant dense<0.000000e+00> : vector<16xf32>
    %175 = vector.multi_reduction <add>, %174, %cst_122 [1] : vector<16x16xf32> to vector<16xf32>
    %176 = vector.shape_cast %175 : vector<16xf32> to vector<16x1xf32>
    %177 = tpu.reciprocal %176 {approx = true} : vector<16x1xf32> -> vector<16x1xf32>
    %178 = vector.broadcast %177 : vector<16x1xf32> to vector<16x16xf32>
    %179 = arith.mulf %174, %178 : vector<16x16xf32>
    %cst_123 = arith.constant dense<0.000000e+00> : vector<8x16xf32>
    %180 = tpu.matmul %166, %179, %cst_123 {dimension_numbers = #tpu.dot_dimension_numbers<[1], [1], [0], [0], [0, 0, 1, 0], [], []>} : vector<8x16xf32>, vector<16x16xf32>, vector<8x16xf32> -> vector<8x16xf32>
    %c7_124 = arith.constant 7 : index
    %c0_125 = arith.constant 0 : index
    %c0_126 = arith.constant 0 : index
    %181 = vector.load %arg5[%c7_124, %c0_125, %c0_126] : memref<8x8x16xf32, #tpu.memory_space<vmem>>, vector<1x8x16xf32>
    %182 = vector.shape_cast %181 : vector<1x8x16xf32> to vector<8x16xf32>
    %183 = vector.shape_cast %180 : vector<8x16xf32> to vector<1x8x16xf32>
    tpu.vector_store %arg5[%c7_124, %c0_125, %c0_126], %183 {strides = array<i32>} : memref<8x8x16xf32, #tpu.memory_space<vmem>>, vector<1x8x16xf32>,
    return
  }
  func.func @transform_0(%arg0: i32, %arg1: i32) -> (i32, i32, i32) {
    %c0_i32 = arith.constant 0 : i32
    %c0_i32_0 = arith.constant 0 : i32
    return %arg0, %c0_i32, %arg1 : i32, i32, i32
  }
  func.func @transform_1(%arg0: i32, %arg1: i32) -> (i32, i32, i32) {
    %c1_i32 = arith.constant 1 : i32
    %c0_i32 = arith.constant 0 : i32
    %c0_i32_0 = arith.constant 0 : i32
    return %arg0, %c1_i32, %c0_i32 : i32, i32, i32
  }
  func.func @transform_2(%arg0: i32, %arg1: i32) -> (i32, i32, i32) {
    %c2_i32 = arith.constant 2 : i32
    %c0_i32 = arith.constant 0 : i32
    %c0_i32_0 = arith.constant 0 : i32
    return %arg0, %c2_i32, %c0_i32 : i32, i32, i32
  }
  func.func @transform_3(%arg0: i32, %arg1: i32) -> (i32, i32, i32) {
    %c0_i32 = arith.constant 0 : i32
    %c0_i32_0 = arith.constant 0 : i32
    return %arg0, %c0_i32, %arg1 : i32, i32, i32
  }
}

</mosaic_0001>

<bundles_post_ra>
// kernel: tpu_custom_call.1
= control target key start
LH: loop header
LB: loop body
LE: loop exit
PB: predicated region body
PF: predicated region fallthrough
CT: control target
= control target key end

     0   :  { %s2519_s0 = inlined_call_operand.vmem [shape: f32[8,24,16], index: 0, kind: input, shape index: {}]   ;;  %s2520_s1 = inlined_call_operand.vmem [shape: f32[8,24,16], index: 1, kind: input, shape index: {}]   ;;  %s2521_s2 = inlined_call_operand.vmem [shape: f32[8,24,16], index: 2, kind: input, shape index: {}]   ;;  %s2522_s3 = inlined_call_operand.hbm [shape: f32[8,8,16], index: 3, kind: output, shape index: {}]  }
   0x1   :  { %v53_v0 = vld [vmem:[%s2519_s0] sm:$0xff]  ;;  %v2016_v1 = vld [vmem:[%s2520_s1 + $0x8] sm:$0xff]  ;;  %v55_v3 = vld [vmem:[%s2519_s0 + $0x18] sm:$0xff] }
   0x2   :  { %v209_v2 = vmul.f32 0.35355338, %v53_v0  ;;  %2120 = vmatprep.subr.mxu1 %v2016_v1 }
   0x3   :  { %8 = vsyncpa [#allocation6], 0  ;;  %2121 = vmatpush3.msra.mxu1 %v2016_v1  ;;  %v433_v4 = vmul.f32 0.35355338, %v55_v3  ;;  %v2017_v5 = vld [vmem:[%s2520_s1 + $0x20] sm:$0xff]  ;;  %vm242_vm0 = vcmask 64512  }
   0x4   :  { %210 = vxpose.xlu0.b32.start.end [1/1] (short) (narrow) %v209_v2, 16  ;;  %2132 = vmatprep.subr.mxu0 %v2017_v5  ;;  %vm324_vm1 = vcmask 130048   ;;  %v59_v18 = vld [vmem:[%s2519_s0 + $0x48] sm:$0xff]  ;;  %v2307_v40 = vmov 0.0   ;;  %vm2308_vm2 = vmmov 0   ;;  %v57_v41 = vld [vmem:[%s2519_s0 + $0x30] sm:$0xff] }
   0x5   :  { %2133 = vmatpush3.msra.mxu0 %v2017_v5  ;;  %v879_v19 = vmul.f32 0.35355338, %v59_v18  ;;  %2125 = vmatprep.subr.mxu1 %v2307_v40  ;;  %v656_v42 = vmul.f32 0.35355338, %v57_v41  ;;  %v2018_v53 = vld [vmem:[%s2520_s1 + $0x38] sm:$0xff]  ;;  %v2024_v54 = vld [vmem:[%s2521_s2 + $0x10] sm:$0xff] }
   0x6   :  { %2137 = vmatprep.subr.mxu0 %v2307_v40  ;;  %v2019_v58 = vld [vmem:[%s2520_s1 + $0x50] sm:$0xff]  ;;  %v2025_v59 = vld [vmem:[%s2521_s2 + $0x28] sm:$0xff]  ;;  %s2309_s4 = smov [#allocation5]  }
   0x7   :  { %s1993_s5 = sshll.u32 %s2309_s4, 4  ;;  %s1994_s5 = int_to_ptr.vmem [resolvable:$true] %s1993_s5 }
   0x8   :  { %s2285_s6 = scalar_lea.vmem %s1994_s5, 1024  ;;  %p2290_p1 = scmp.lt.s32.totalorder %s1994_s5, %s1994_s5 }
   0x9   :  { %434 = vxpose.xlu0.b32.start.end [1/1] (short) (narrow) %v433_v4, 16  ;;  %p2286_p0 = scmp.ne.s32.totalorder %s1994_s5, %s2285_s6  ;;  %p2291_p2 = scmp.lt.s32.totalorder %s2285_s6, %s2285_s6 }
   0xb   :  { %p2292_p3 = por %p2291_p2, %p2290_p1 }
   0xd   :  { %p2293_p4 = pnand %p2292_p3, %p2286_p0 }
  0x80   :  { %v226_v6 = vpop.trf.xlu0 }
  0x81   :  { %2122 = vmatprep.mubr.msk.f32.mxu1 %vm242_vm0, %v226_v6 }
  0x84   :  { %v227_v7 = vpop.trf.xlu0 }
  0x85   :  { %2123 = vmatmul.mubr.msk.f32.vlgmr.msra.gmra.mxu1 %vm242_vm0, %v227_v7 }
  0x86   :  { %2129 = vmatprep.mubr.msk.f32.mxu1 %vm2308_vm2, %v2307_v40 }
  0x88   :  { %v450_v8 = vpop.trf.xlu0 }
  0x89   :  { %2134 = vmatprep.mubr.msk.f32.mxu0 %vm242_vm0, %v450_v8 }
  0x8c   :  { %v451_v9 = vpop.trf.xlu0 }
  0x8d   :  { %2135 = vmatmul.mubr.msk.f32.vlgmr.msra.gmra.mxu0 %vm242_vm0, %v451_v9 }
  0x8e   :  { %2141 = vmatprep.mubr.msk.f32.mxu0 %vm2308_vm2, %v2307_v40 }
 0x145   :  { %v2124_v10 = vpop.f32.mrf.mxu1 }
 0x146   :  { %v328_v11 = vsel %vm324_vm1, %v2124_v10, -inf }
 0x147   :  { %329 = vmax.xlane.f32.xlu1 %v328_v11  ;;  %v315_v14 = vpop.f32.mrf.mxu1  ;;  %v63_v11 = vld [vmem:[%s2519_s0 + $0x78] sm:$0xff] }
 0x148   :  { %v325_v17 = vsel %vm324_vm1, %v315_v14, -inf }
 0x14d   :  { %v2136_v12 = vpop.f32.mrf.mxu0 }
 0x14e   :  { %v550_v13 = vsel %vm324_vm1, %v2136_v12, -inf }
 0x14f   :  { %551 = vmax.xlane.f32.xlu1 %v550_v13  ;;  %v538_v15 = vpop.f32.mrf.mxu0 }
 0x150   :  { %v547_v16 = vsel %vm324_vm1, %v538_v15, -inf }
 0x151   :  { %548 = vmax.xlane.f32.xlu0 %v547_v16 }
 0x153   :  { %326 = vmax.xlane.f32.xlu1 %v325_v17 }
 0x17e   :  { %880 = vxpose.xlu0.b32.start.end [1/1] (short) (narrow) %v879_v19, 16 }
 0x1d0   :  { %v330_v20 = vpop.xlane.xlu1 %329 }
 0x1d1   :  { %v332_v21 = vsub.f32 %v2124_v10, %v330_v20 }
 0x1d3   :  { %v335_v22 = vmul.f32 1.442695, %v332_v21 }
 0x1d5   :  { %2221 = vpow2.f32 %v335_v22 }
 0x1d8   :  { %v552_v23 = vpop.xlane.xlu1 %551 }
 0x1d9   :  { %v554_v24 = vsub.f32 %v2136_v12, %v552_v23  ;;  %v1325_v12 = vmul.f32 0.35355338, %v63_v11 }
 0x1da   :  { %v549_v25 = vpop.xlane.xlu0 %548 }
 0x1db   :  { %v557_v26 = vmul.f32 1.442695, %v554_v24  ;;  %v553_v27 = vsub.f32 %v538_v15, %v549_v25 }
 0x1dc   :  { %v327_v28 = vpop.xlane.xlu1 %326 }
 0x1dd   :  { %2223 = vpow2.f32 %v557_v26  ;;  %v331_v29 = vsub.f32 %v315_v14, %v327_v28  ;;  %v555_v30 = vmul.f32 1.442695, %v553_v27 }
 0x1df   :  { %v333_v31 = vmul.f32 1.442695, %v331_v29 }
 0x1e1   :  { %2225 = vpow2.f32 %v333_v31 }
 0x1e2   :  { %v2222_v32 = vpop.eup %2221  ;;  %2227 = vpow2.f32 %v555_v30 }
 0x1e3   :  { %v340_v33 = vsel %vm324_vm1, %v2222_v32, 0.0 }
 0x1e4   :  { %341 = vadd.xlane.f32.xlu1 %v340_v33  ;;  %v61_v33 = vld [vmem:[%s2519_s0 + $0x60] sm:$0xff] }
 0x1ea   :  { %v2224_v34 = vpop.eup %2223 }
 0x1eb   :  { %v562_v35 = vsel %vm324_vm1, %v2224_v34, 0.0 }
 0x1ec   :  { %563 = vadd.xlane.f32.xlu1 %v562_v35 }
 0x1ee   :  { %v2226_v36 = vpop.eup %2225 }
 0x1ef   :  { %v337_v37 = vsel %vm324_vm1, %v2226_v36, 0.0  ;;  %v2228_v38 = vpop.eup %2227 }
 0x1f0   :  { %338 = vadd.xlane.f32.xlu1 %v337_v37  ;;  %v559_v39 = vsel %vm324_vm1, %v2228_v38, 0.0 }
 0x1f4   :  { %560 = vadd.xlane.f32.xlu1 %v559_v39 }
 0x1fa   :  { %v896_v57 = vpop.trf.xlu0 }
 0x1fe   :  { %v897_v60 = vpop.trf.xlu0 }
 0x227   :  { %657 = vxpose.xlu1.b32.start.end [1/1] (short) (narrow) %v656_v42, 16 }
 0x26d   :  { %v342_v43 = vpop.xlane.xlu1 %341 }
 0x26e   :  { %2229 = vrcp.f32 %v342_v43 }
 0x275   :  { %v564_v44 = vpop.xlane.xlu1 %563 }
 0x276   :  { %2231 = vrcp.f32 %v564_v44 }
 0x279   :  { %v339_v45 = vpop.xlane.xlu1 %338 }
 0x27a   :  { %2233 = vrcp.f32 %v339_v45 }
 0x27b   :  { %v2230_v46 = vpop.eup %2229 }
 0x27c   :  { %v346_v47 = vmul.f32 %v2230_v46, %v2222_v32  ;;  %v2020_v46 = vld [vmem:[%s2520_s1 + $0x68] sm:$0xff] }
 0x27d   :  { %v561_v48 = vpop.xlane.xlu1 %560 }
 0x27e   :  { %2235 = vrcp.f32 %v561_v48  ;;  %2126 = vmatpush3.xpose.msk.msra.mxu1 %vm324_vm1, %v346_v47  ;;  %v2026_v47 = vld [vmem:[%s2521_s2 + $0x40] sm:$0xff] }
 0x27f   :  { %2127 = vmatprep.subr.mxu1 %v2307_v40 }
 0x283   :  { %v2232_v49 = vpop.eup %2231 }
 0x284   :  { %v568_v50 = vmul.f32 %v2232_v49, %v2224_v34  ;;  %v1102_v34 = vmul.f32 0.35355338, %v61_v33 }
 0x286   :  { %2138 = vmatpush3.xpose.msk.msra.mxu0 %vm324_vm1, %v568_v50 }
 0x287   :  { %v2234_v51 = vpop.eup %2233  ;;  %2139 = vmatprep.subr.mxu0 %v2307_v40 }
 0x288   :  { %v345_v52 = vmul.f32 %v2234_v51, %v2226_v36  ;;  %v2021_v51 = vld [vmem:[%s2520_s1 + $0x80] sm:$0xff] }
 0x28a   :  { %2128 = vmatpush3.xpose.msk.msra.mxu1 %vm324_vm1, %v345_v52  ;;  %v2027_v52 = vld [vmem:[%s2521_s2 + $0x58] sm:$0xff] }
 0x28b   :  { %v2236_v55 = vpop.eup %2235  ;;  %2144 = vmatprep.subr.mxu1 %v2018_v53 }
 0x28c   :  { %v567_v56 = vmul.f32 %v2236_v55, %v2228_v38 }
 0x28d   :  { %2130 = vmatmul.mubr.msk.f32.vlgmr.msra.gmra.mxu1 %vm324_vm1, %v2024_v54 }
 0x28e   :  { %2140 = vmatpush3.xpose.msk.msra.mxu0 %vm324_vm1, %v567_v56  ;;  %2145 = vmatpush3.msra.mxu1 %v2018_v53 }
 0x28f   :  { %2156 = vmatprep.subr.mxu0 %v2019_v58  ;;  %2149 = vmatprep.subr.mxu1 %v2307_v40 }
 0x291   :  { %2142 = vmatmul.mubr.msk.f32.vlgmr.msra.gmra.mxu0 %vm324_vm1, %v2025_v59 }
 0x292   :  { %2157 = vmatpush3.msra.mxu0 %v2019_v58  ;;  %2158 = vmatprep.mubr.msk.f32.mxu0 %vm242_vm0, %v896_v57 }
 0x293   :  { %2161 = vmatprep.subr.mxu0 %v2307_v40 }
 0x295   :  { %2159 = vmatmul.mubr.msk.f32.vlgmr.msra.gmra.mxu0 %vm242_vm0, %v897_v60 }
 0x296   :  { %2165 = vmatprep.mubr.msk.f32.mxu0 %vm2308_vm2, %v2307_v40 }
 0x2a3   :  { %v673_v61 = vpop.trf.xlu1 }
 0x2a4   :  { %2146 = vmatprep.mubr.msk.f32.mxu1 %vm242_vm0, %v673_v61 }
 0x2a7   :  { %v674_v62 = vpop.trf.xlu1 }
 0x2a8   :  { %2147 = vmatmul.mubr.msk.f32.vlgmr.msra.gmra.mxu1 %vm242_vm0, %v674_v62 }
 0x2a9   :  { %2153 = vmatprep.mubr.msk.f32.mxu1 %vm2308_vm2, %v2307_v40 }
 0x34d   :  { %v422_v63 = vpop.f32.mrf.mxu1 }
 0x34e   :  { %426 = vst.msk [vmem:[#allocation5] sm:$0xff] %vm324_vm1, %v422_v63 }
 0x34f   :  { %v2131_v0 = vpop.f32.mrf.mxu1 }
 0x351   :  { %v644_v1 = vpop.f32.mrf.mxu0 }
 0x352   :  { %649 = vst.msk [vmem:[#allocation5 + $0x8] sm:$0xff] %vm324_vm1, %v644_v1 }
 0x353   :  { %v2143_v2 = vpop.f32.mrf.mxu0 }
 0x355   :  { %v2160_v3 = vpop.f32.mrf.mxu0 }
 0x356   :  { %v996_v4 = vsel %vm324_vm1, %v2160_v3, -inf }
 0x357   :  { %997 = vmax.xlane.f32.xlu0 %v996_v4  ;;  %v984_v9 = vpop.f32.mrf.mxu0 }
 0x358   :  { %v993_v10 = vsel %vm324_vm1, %v984_v9, -inf }
 0x368   :  { %v2148_v5 = vpop.f32.mrf.mxu1 }
 0x369   :  { %v773_v6 = vsel %vm324_vm1, %v2148_v5, -inf }
 0x36a   :  { %774 = vmax.xlane.f32.xlu1 %v773_v6  ;;  %v761_v7 = vpop.f32.mrf.mxu1 }
 0x36b   :  { %v770_v8 = vsel %vm324_vm1, %v761_v7, -inf }
 0x36e   :  { %771 = vmax.xlane.f32.xlu1 %v770_v8 }
 0x372   :  { %994 = vmax.xlane.f32.xlu1 %v993_v10 }
 0x384   :  { %1326 = vxpose.xlu0.b32.start.end [1/1] (short) (narrow) %v1325_v12, 16 }
 0x3e0   :  { %v998_v13 = vpop.xlane.xlu0 %997 }
 0x3e1   :  { %v1000_v14 = vsub.f32 %v2160_v3, %v998_v13 }
 0x3e3   :  { %v1003_v17 = vmul.f32 1.442695, %v1000_v14 }
 0x3f3   :  { %v775_v15 = vpop.xlane.xlu1 %774 }
 0x3f4   :  { %v777_v16 = vsub.f32 %v2148_v5, %v775_v15 }
 0x3f6   :  { %v780_v18 = vmul.f32 1.442695, %v777_v16 }
 0x3f7   :  { %v772_v19 = vpop.xlane.xlu1 %771 }
 0x3f8   :  { %2237 = vpow2.f32 %v780_v18  ;;  %v776_v20 = vsub.f32 %v761_v7, %v772_v19 }
 0x3f9   :  { %2239 = vpow2.f32 %v1003_v17 }
 0x3fa   :  { %v778_v21 = vmul.f32 1.442695, %v776_v20 }
 0x3fb   :  { %v995_v22 = vpop.xlane.xlu1 %994 }
 0x3fc   :  { %v999_v23 = vsub.f32 %v984_v9, %v995_v22  ;;  %2241 = vpow2.f32 %v778_v21 }
 0x3fe   :  { %v1001_v24 = vmul.f32 1.442695, %v999_v23 }
 0x400   :  { %2243 = vpow2.f32 %v1001_v24  ;;  %v1342_v50 = vpop.trf.xlu0  ;;  %v65_v24 = vld [vmem:[%s2519_s0 + $0x90] sm:$0xff] }
 0x404   :  { %v1343_v53 = vpop.trf.xlu0 }
 0x405   :  { %v2238_v25 = vpop.eup %2237 }
 0x406   :  { %v785_v26 = vsel %vm324_vm1, %v2238_v25, 0.0  ;;  %v2240_v27 = vpop.eup %2239 }
 0x407   :  { %786 = vadd.xlane.f32.xlu1 %v785_v26  ;;  %v1008_v28 = vsel %vm324_vm1, %v2240_v27, 0.0  ;;  %v67_v26 = vld [vmem:[%s2519_s0 + $0xa8] sm:$0xff] }
 0x409   :  { %v2242_v29 = vpop.eup %2241 }
 0x40a   :  { %v782_v30 = vsel %vm324_vm1, %v2242_v29, 0.0 }
 0x40b   :  { %1009 = vadd.xlane.f32.xlu1 %v1008_v28 }
 0x40d   :  { %v2244_v31 = vpop.eup %2243 }
 0x40e   :  { %v1005_v32 = vsel %vm324_vm1, %v2244_v31, 0.0 }
 0x40f   :  { %783 = vadd.xlane.f32.xlu1 %v782_v30 }
 0x413   :  { %1006 = vadd.xlane.f32.xlu1 %v1005_v32 }
 0x446   :  { %1103 = vxpose.xlu1.b32.start.end [1/1] (short) (narrow) %v1102_v34, 16 }
 0x490   :  { %v787_v35 = vpop.xlane.xlu1 %786 }
 0x491   :  { %2245 = vrcp.f32 %v787_v35 }
 0x494   :  { %v1010_v36 = vpop.xlane.xlu1 %1009 }
 0x495   :  { %2247 = vrcp.f32 %v1010_v36 }
 0x498   :  { %v784_v37 = vpop.xlane.xlu1 %783 }
 0x499   :  { %2249 = vrcp.f32 %v784_v37 }
 0x49c   :  { %v1007_v38 = vpop.xlane.xlu1 %1006 }
 0x49d   :  { %2251 = vrcp.f32 %v1007_v38  ;;  %v2022_v38 = vld [vmem:[%s2520_s1 + $0x98] sm:$0xff] }
 0x49e   :  { %v2246_v39 = vpop.eup %2245 }
 0x49f   :  { %v791_v41 = vmul.f32 %v2246_v39, %v2238_v25  ;;  %v1548_v25 = vmul.f32 0.35355338, %v65_v24 }
 0x4a1   :  { %2150 = vmatpush3.xpose.msk.msra.mxu1 %vm324_vm1, %v791_v41 }
 0x4a2   :  { %v2248_v42 = vpop.eup %2247  ;;  %2151 = vmatprep.subr.mxu1 %v2307_v40 }
 0x4a3   :  { %v1014_v43 = vmul.f32 %v2248_v42, %v2240_v27  ;;  %v1771_v27 = vmul.f32 0.35355338, %v67_v26  ;;  %v2028_v42 = vld [vmem:[%s2521_s2 + $0x70] sm:$0xff] }
 0x4a5   :  { %2162 = vmatpush3.xpose.msk.msra.mxu0 %vm324_vm1, %v1014_v43  ;;  %v2023_v43 = vld [vmem:[%s2520_s1 + $0xb0] sm:$0xff] }
 0x4a6   :  { %v2250_v44 = vpop.eup %2249  ;;  %2163 = vmatprep.subr.mxu0 %v2307_v40 }
 0x4a7   :  { %v790_v45 = vmul.f32 %v2250_v44, %v2242_v29  ;;  %v2029_v44 = vld [vmem:[%s2521_s2 + $0x88] sm:$0xff] }
 0x4a9   :  { %2152 = vmatpush3.xpose.msk.msra.mxu1 %vm324_vm1, %v790_v45 }
 0x4aa   :  { %v2252_v48 = vpop.eup %2251  ;;  %2168 = vmatprep.subr.mxu1 %v2020_v46 }
 0x4ab   :  { %v1013_v49 = vmul.f32 %v2252_v48, %v2244_v31 }
 0x4ac   :  { %2154 = vmatmul.mubr.msk.f32.vlgmr.msra.gmra.mxu1 %vm324_vm1, %v2026_v47 }
 0x4ad   :  { %2164 = vmatpush3.xpose.msk.msra.mxu0 %vm324_vm1, %v1013_v49  ;;  %2169 = vmatpush3.msra.mxu1 %v2020_v46 }
 0x4ae   :  { %2180 = vmatprep.subr.mxu0 %v2021_v51  ;;  %2173 = vmatprep.subr.mxu1 %v2307_v40 }
 0x4b0   :  { %2166 = vmatmul.mubr.msk.f32.vlgmr.msra.gmra.mxu0 %vm324_vm1, %v2027_v52 }
 0x4b1   :  { %2181 = vmatpush3.msra.mxu0 %v2021_v51  ;;  %2182 = vmatprep.mubr.msk.f32.mxu0 %vm242_vm0, %v1342_v50 }
 0x4b2   :  { %2185 = vmatprep.subr.mxu0 %v2307_v40 }
 0x4b4   :  { %2183 = vmatmul.mubr.msk.f32.vlgmr.msra.gmra.mxu0 %vm242_vm0, %v1343_v53 }
 0x4b5   :  { %2189 = vmatprep.mubr.msk.f32.mxu0 %vm2308_vm2, %v2307_v40 }
 0x4c2   :  { %v1119_v54 = vpop.trf.xlu1 }
 0x4c3   :  { %2170 = vmatprep.mubr.msk.f32.mxu1 %vm242_vm0, %v1119_v54 }
 0x4c6   :  { %v1120_v55 = vpop.trf.xlu1 }
 0x4c7   :  { %2171 = vmatmul.mubr.msk.f32.vlgmr.msra.gmra.mxu1 %vm242_vm0, %v1120_v55 }
 0x4c8   :  { %2177 = vmatprep.mubr.msk.f32.mxu1 %vm2308_vm2, %v2307_v40 }
 0x56c   :  { %v867_v56 = vpop.f32.mrf.mxu1 }
 0x56d   :  { %872 = vst.msk [vmem:[#allocation5 + $0x10] sm:$0xff] %vm324_vm1, %v867_v56 }
 0x56e   :  { %v2155_v57 = vpop.f32.mrf.mxu1 }
 0x570   :  { %v1090_v58 = vpop.f32.mrf.mxu0 }
 0x571   :  { %1095 = vst.msk [vmem:[#allocation5 + $0x18] sm:$0xff] %vm324_vm1, %v1090_v58 }
 0x572   :  { %v2167_v59 = vpop.f32.mrf.mxu0 }
 0x574   :  { %v2184_v60 = vpop.f32.mrf.mxu0 }
 0x575   :  { %v1442_v61 = vsel %vm324_vm1, %v2184_v60, -inf }
 0x576   :  { %1443 = vmax.xlane.f32.xlu1 %v1442_v61  ;;  %v1430_v2 = vpop.f32.mrf.mxu0 }
 0x577   :  { %v1439_v3 = vsel %vm324_vm1, %v1430_v2, -inf }
 0x587   :  { %v2172_v62 = vpop.f32.mrf.mxu1 }
 0x588   :  { %v1219_v63 = vsel %vm324_vm1, %v2172_v62, -inf }
 0x589   :  { %1220 = vmax.xlane.f32.xlu0 %v1219_v63  ;;  %v1207_v0 = vpop.f32.mrf.mxu1 }
 0x58a   :  { %v1216_v1 = vsel %vm324_vm1, %v1207_v0, -inf }
 0x58b   :  { %1217 = vmax.xlane.f32.xlu1 %v1216_v1 }
 0x58f   :  { %1440 = vmax.xlane.f32.xlu1 %v1439_v3 }
 0x5ff   :  { %v1444_v4 = vpop.xlane.xlu1 %1443 }
 0x600   :  { %v1446_v5 = vsub.f32 %v2184_v60, %v1444_v4 }
 0x602   :  { %v1449_v6 = vmul.f32 1.442695, %v1446_v5 }
 0x604   :  { %2253 = vpow2.f32 %v1449_v6 }
 0x611   :  { %v2254_v7 = vpop.eup %2253 }
 0x612   :  { %v1221_v8 = vpop.xlane.xlu0 %1220  ;;  %v1454_v9 = vsel %vm324_vm1, %v2254_v7, 0.0 }
 0x613   :  { %v1223_v10 = vsub.f32 %v2172_v62, %v1221_v8  ;;  %1455 = vadd.xlane.f32.xlu1 %v1454_v9 }
 0x614   :  { %v1218_v11 = vpop.xlane.xlu1 %1217 }
 0x615   :  { %v1226_v12 = vmul.f32 1.442695, %v1223_v10  ;;  %v1222_v13 = vsub.f32 %v1207_v0, %v1218_v11 }
 0x617   :  { %2255 = vpow2.f32 %v1226_v12  ;;  %v1224_v14 = vmul.f32 1.442695, %v1222_v13 }
 0x618   :  { %v1441_v15 = vpop.xlane.xlu1 %1440 }
 0x619   :  { %2257 = vpow2.f32 %v1224_v14  ;;  %v1445_v16 = vsub.f32 %v1430_v2, %v1441_v15 }
 0x61b   :  { %v1447_v17 = vmul.f32 1.442695, %v1445_v16 }
 0x61d   :  { %2259 = vpow2.f32 %v1447_v17 }
 0x624   :  { %v2256_v18 = vpop.eup %2255 }
 0x625   :  { %v1231_v19 = vsel %vm324_vm1, %v2256_v18, 0.0 }
 0x626   :  { %v2258_v20 = vpop.eup %2257  ;;  %1232 = vadd.xlane.f32.xlu0 %v1231_v19 }
 0x627   :  { %v1228_v21 = vsel %vm324_vm1, %v2258_v20, 0.0 }
 0x62a   :  { %v2260_v22 = vpop.eup %2259  ;;  %1229 = vadd.xlane.f32.xlu0 %v1228_v21 }
 0x62b   :  { %v1451_v23 = vsel %vm324_vm1, %v2260_v22, 0.0 }
 0x62c   :  { %1452 = vadd.xlane.f32.xlu1 %v1451_v23 }
 0x657   :  { %1549 = vxpose.xlu0.b32.start.end [1/1] (short) (narrow) %v1548_v25, 16  ;;  %v2030_v25 = vld [vmem:[%s2521_s2 + $0xa0] sm:$0xff] }
 0x65f   :  { %1772 = vxpose.xlu1.b32.start.end [1/1] (short) (narrow) %v1771_v27, 16 }
 0x69c   :  { %v1456_v28 = vpop.xlane.xlu1 %1455 }
 0x69d   :  { %2261 = vrcp.f32 %v1456_v28 }
 0x6aa   :  { %v2262_v29 = vpop.eup %2261 }
 0x6ab   :  { %v1460_v30 = vmul.f32 %v2262_v29, %v2254_v7 }
 0x6ad   :  { %2186 = vmatpush3.xpose.msk.msra.mxu0 %vm324_vm1, %v1460_v30  ;;  %v2031_v30 = vld [vmem:[%s2521_s2 + $0xb8] sm:$0xff] }
 0x6ae   :  { %2187 = vmatprep.subr.mxu0 %v2307_v40 }
 0x6af   :  { %v1233_v31 = vpop.xlane.xlu0 %1232 }
 0x6b0   :  { %2263 = vrcp.f32 %v1233_v31 }
 0x6b3   :  { %v1230_v32 = vpop.xlane.xlu0 %1229 }
 0x6b4   :  { %2265 = vrcp.f32 %v1230_v32 }
 0x6b5   :  { %v1453_v33 = vpop.xlane.xlu1 %1452 }
 0x6b6   :  { %2267 = vrcp.f32 %v1453_v33 }
 0x6bd   :  { %v2264_v34 = vpop.eup %2263 }
 0x6be   :  { %v1237_v35 = vmul.f32 %v2264_v34, %v2256_v18 }
 0x6c0   :  { %2174 = vmatpush3.xpose.msk.msra.mxu1 %vm324_vm1, %v1237_v35 }
 0x6c1   :  { %v2266_v36 = vpop.eup %2265  ;;  %2175 = vmatprep.subr.mxu1 %v2307_v40 }
 0x6c2   :  { %v1236_v37 = vmul.f32 %v2266_v36, %v2258_v20 }
 0x6c3   :  { %v2268_v39 = vpop.eup %2267 }
 0x6c4   :  { %2176 = vmatpush3.xpose.msk.msra.mxu1 %vm324_vm1, %v1236_v37  ;;  %v1459_v41 = vmul.f32 %v2268_v39, %v2260_v22 }
 0x6c5   :  { %2192 = vmatprep.subr.mxu1 %v2022_v38 }
 0x6c6   :  { %2188 = vmatpush3.xpose.msk.msra.mxu0 %vm324_vm1, %v1459_v41 }
 0x6c7   :  { %2178 = vmatmul.mubr.msk.f32.vlgmr.msra.gmra.mxu1 %vm324_vm1, %v2028_v42  ;;  %2204 = vmatprep.subr.mxu0 %v2023_v43 }
 0x6c8   :  { %2193 = vmatpush3.msra.mxu1 %v2022_v38 }
 0x6c9   :  { %2190 = vmatmul.mubr.msk.f32.vlgmr.msra.gmra.mxu0 %vm324_vm1, %v2029_v44  ;;  %2197 = vmatprep.subr.mxu1 %v2307_v40 }
 0x6ca   :  { %2205 = vmatpush3.msra.mxu0 %v2023_v43 }
 0x6cb   :  { %2209 = vmatprep.subr.mxu0 %v2307_v40 }
 0x6d3   :  { %v1565_v45 = vpop.trf.xlu0 }
 0x6d4   :  { %2194 = vmatprep.mubr.msk.f32.mxu1 %vm242_vm0, %v1565_v45 }
 0x6d7   :  { %v1566_v46 = vpop.trf.xlu0 }
 0x6d8   :  { %2195 = vmatmul.mubr.msk.f32.vlgmr.msra.gmra.mxu1 %vm242_vm0, %v1566_v46 }
 0x6d9   :  { %2201 = vmatprep.mubr.msk.f32.mxu1 %vm2308_vm2, %v2307_v40 }
 0x6db   :  { %v1788_v47 = vpop.trf.xlu1 }
 0x6dc   :  { %2206 = vmatprep.mubr.msk.f32.mxu0 %vm242_vm0, %v1788_v47 }
 0x6df   :  { %v1789_v48 = vpop.trf.xlu1 }
 0x6e0   :  { %2207 = vmatmul.mubr.msk.f32.vlgmr.msra.gmra.mxu0 %vm242_vm0, %v1789_v48 }
 0x6e1   :  { %2213 = vmatprep.mubr.msk.f32.mxu0 %vm2308_vm2, %v2307_v40 }
 0x787   :  { %v1313_v49 = vpop.f32.mrf.mxu1 }
 0x788   :  { %1318 = vst.msk [vmem:[#allocation5 + $0x20] sm:$0xff] %vm324_vm1, %v1313_v49 }
 0x789   :  { %v2179_v50 = vpop.f32.mrf.mxu1  ;;  %v1536_v51 = vpop.f32.mrf.mxu0 }
 0x78a   :  { %1541 = vst.msk [vmem:[#allocation5 + $0x28] sm:$0xff] %vm324_vm1, %v1536_v51 }
 0x78b   :  { %v2191_v52 = vpop.f32.mrf.mxu0 }
 0x798   :  { %v2196_v53 = vpop.f32.mrf.mxu1 }
 0x799   :  { %v1665_v54 = vsel %vm324_vm1, %v2196_v53, -inf }
 0x79a   :  { %1666 = vmax.xlane.f32.xlu0 %v1665_v54  ;;  %v1653_v55 = vpop.f32.mrf.mxu1 }
 0x79b   :  { %v1662_v56 = vsel %vm324_vm1, %v1653_v55, -inf }
 0x79e   :  { %1663 = vmax.xlane.f32.xlu0 %v1662_v56 }
 0x7a0   :  { %v2208_v57 = vpop.f32.mrf.mxu0 }
 0x7a1   :  { %v1888_v58 = vsel %vm324_vm1, %v2208_v57, -inf }
 0x7a2   :  { %1889 = vmax.xlane.f32.xlu1 %v1888_v58  ;;  %v1876_v59 = vpop.f32.mrf.mxu0 }
 0x7a3   :  { %v1885_v60 = vsel %vm324_vm1, %v1876_v59, -inf }
 0x7a6   :  { %1886 = vmax.xlane.f32.xlu1 %v1885_v60 }
 0x823   :  { %v1667_v61 = vpop.xlane.xlu0 %1666 }
 0x824   :  { %v1669_v62 = vsub.f32 %v2196_v53, %v1667_v61 }
 0x826   :  { %v1672_v63 = vmul.f32 1.442695, %v1669_v62 }
 0x827   :  { %v1664_v0 = vpop.xlane.xlu0 %1663 }
 0x828   :  { %2269 = vpow2.f32 %v1672_v63  ;;  %v1668_v1 = vsub.f32 %v1653_v55, %v1664_v0 }
 0x82a   :  { %v1670_v2 = vmul.f32 1.442695, %v1668_v1 }
 0x82b   :  { %v1890_v3 = vpop.xlane.xlu1 %1889 }
 0x82c   :  { %2271 = vpow2.f32 %v1670_v2  ;;  %v1892_v4 = vsub.f32 %v2208_v57, %v1890_v3 }
 0x82e   :  { %v1895_v5 = vmul.f32 1.442695, %v1892_v4 }
 0x82f   :  { %v1887_v6 = vpop.xlane.xlu1 %1886 }
 0x830   :  { %2273 = vpow2.f32 %v1895_v5  ;;  %v1891_v7 = vsub.f32 %v1876_v59, %v1887_v6 }
 0x832   :  { %v1893_v8 = vmul.f32 1.442695, %v1891_v7 }
 0x834   :  { %2275 = vpow2.f32 %v1893_v8 }
 0x835   :  { %v2270_v9 = vpop.eup %2269 }
 0x836   :  { %v1677_v10 = vsel %vm324_vm1, %v2270_v9, 0.0 }
 0x837   :  { %1678 = vadd.xlane.f32.xlu0 %v1677_v10 }
 0x839   :  { %v2272_v11 = vpop.eup %2271 }
 0x83a   :  { %v1674_v12 = vsel %vm324_vm1, %v2272_v11, 0.0 }
 0x83b   :  { %1675 = vadd.xlane.f32.xlu0 %v1674_v12 }
 0x83d   :  { %v2274_v13 = vpop.eup %2273 }
 0x83e   :  { %v1900_v14 = vsel %vm324_vm1, %v2274_v13, 0.0 }
 0x83f   :  { %1901 = vadd.xlane.f32.xlu1 %v1900_v14 }
 0x841   :  { %v2276_v15 = vpop.eup %2275 }
 0x842   :  { %v1897_v16 = vsel %vm324_vm1, %v2276_v15, 0.0 }
 0x843   :  { %1898 = vadd.xlane.f32.xlu1 %v1897_v16 }
 0x8c0   :  { %v1679_v17 = vpop.xlane.xlu0 %1678 }
 0x8c1   :  { %2277 = vrcp.f32 %v1679_v17 }
 0x8c4   :  { %v1676_v18 = vpop.xlane.xlu0 %1675 }
 0x8c5   :  { %2279 = vrcp.f32 %v1676_v18 }
 0x8c8   :  { %v1902_v19 = vpop.xlane.xlu1 %1901 }
 0x8c9   :  { %2281 = vrcp.f32 %v1902_v19 }
 0x8cc   :  { %v1899_v20 = vpop.xlane.xlu1 %1898 }
 0x8cd   :  { %2283 = vrcp.f32 %v1899_v20 }
 0x8ce   :  { %v2278_v21 = vpop.eup %2277 }
 0x8cf   :  { %v1683_v22 = vmul.f32 %v2278_v21, %v2270_v9 }
 0x8d1   :  { %2198 = vmatpush3.xpose.msk.msra.mxu1 %vm324_vm1, %v1683_v22 }
 0x8d2   :  { %v2280_v23 = vpop.eup %2279  ;;  %2199 = vmatprep.subr.mxu1 %v2307_v40 }
 0x8d3   :  { %v1682_v24 = vmul.f32 %v2280_v23, %v2272_v11 }
 0x8d5   :  { %2200 = vmatpush3.xpose.msk.msra.mxu1 %vm324_vm1, %v1682_v24 }
 0x8d6   :  { %v2282_v26 = vpop.eup %2281 }
 0x8d7   :  { %v1906_v27 = vmul.f32 %v2282_v26, %v2274_v13 }
 0x8d8   :  { %2202 = vmatmul.mubr.msk.f32.vlgmr.msra.gmra.mxu1 %vm324_vm1, %v2030_v25 }
 0x8d9   :  { %2210 = vmatpush3.xpose.msk.msra.mxu0 %vm324_vm1, %v1906_v27 }
 0x8da   :  { %v2284_v28 = vpop.eup %2283  ;;  %2211 = vmatprep.subr.mxu0 %v2307_v40 }
 0x8db   :  { %v1905_v29 = vmul.f32 %v2284_v28, %v2276_v15 }
 0x8dd   :  { %2212 = vmatpush3.xpose.msk.msra.mxu0 %vm324_vm1, %v1905_v29 }
 0x8e0   :  { %2214 = vmatmul.mubr.msk.f32.vlgmr.msra.gmra.mxu0 %vm324_vm1, %v2031_v30 }
 0x998   :  { %v1759_v31 = vpop.f32.mrf.mxu1 }
 0x999   :  { %1764 = vst.msk [vmem:[#allocation5 + $0x30] sm:$0xff] %vm324_vm1, %v1759_v31 }
 0x99a   :  { %v2203_v32 = vpop.f32.mrf.mxu1 }
 0x9a0   :  { %v1982_v33 = vpop.f32.mrf.mxu0 }
 0x9a1   :  { %1987 = vst.msk [vmem:[#allocation5 + $0x38] sm:$0xff] %vm324_vm1, %v1982_v33 }
 0x9a2   :  { %v2215_v40 = vpop.f32.mrf.mxu0 }
 0x9a3   :  { %2296 = shalt.err (!%p2293_p4)
}
 0x9a4   :  { %s2310_s2 = smov 128   ;;  %s2311_s7 = smov 8  }
 0x9a5   :  { %1999 = dma.vmem_to_hbm [thread:$0]  %s1994_s5, 1024, %s2522_s3, [#allocation6], %s2310_s2, %s2310_s2, %s2311_s7  }
 0x9a6   :  { %2305 = dma.done.wait [#allocation6], 1024  }
 0x9a7   :  { %2306 = vsyncadd [#allocation6], 4294966272 }
 0x9a8   :  { %2003 = vsyncpa [#allocation6], 1 }

</bundles_post_ra>
